<compile_context>
chip_gen: v6e
topology: v6e:2x2x1
jax: 0.10.0
libtpu: 0.0.40
codegen_flags: <defaults>
</compile_context>

<pallas_src>
import math
import functools

import jax
import jax.numpy as jnp
from jax import lax
from jax.experimental import pallas as pl
from jax.experimental.pallas import tpu as pltpu
import numpy as np


def _mha_kernel(x_ref, w_ref, b_ref, mask_ref, o_ref, *, num_heads: int,
                head_dim: int):
    """One batch element per grid step: fused QKV + head-batched causal attention."""
    H, D = num_heads, head_dim
    T = x_ref.shape[1]
    E = H * D

    x = x_ref[0]                                     # (T, E)
    xb = jnp.broadcast_to(x, (H, T, E))              # heads share the activations

    # Fused, head-batched QKV projection: (H,T,E) x (H,E,3D) -> (H,T,3D).
    qkv = lax.dot_general(
        xb, w_ref[...],
        dimension_numbers=(((2,), (1,)), ((0,), (0,))),
        preferred_element_type=jnp.float32,
    ) + b_ref[...]                                    # bias (H, 1, 3D)

    q = qkv[:, :, 0 * D:1 * D]                        # (H, T, D)
    k = qkv[:, :, 1 * D:2 * D]
    v = qkv[:, :, 2 * D:3 * D]

    # Scores: contract the D axis of both operands (no materialized transpose).
    s = lax.dot_general(
        q, k,
        dimension_numbers=(((2,), (2,)), ((0,), (0,))),
        preferred_element_type=jnp.float32,
    ) * (1.0 / math.sqrt(D))                          # (H, T, T)

    # Causal masked_fill (mask precomputed wrapper-side, like the module buffer).
    s = jnp.where(mask_ref[...] == 0.0, -jnp.inf, s)

    # TODO(synk): attn_dropout / ff_dropout are identity in eval mode; training-mode
    # dropout (applied before softmax in the PyTorch module) is not implemented.
    # Softmax in f32; normalizer reciprocal goes to the otherwise-idle EUP slot.
    s = s - jnp.max(s, axis=-1, keepdims=True)
    p = jnp.exp(s)
    p = p * pl.reciprocal(jnp.sum(p, axis=-1, keepdims=True), approx=True)

    # Attention-weighted values: (H,T,T) x (H,T,D) -> (H,T,D), one MXU stream.
    o = lax.dot_general(
        p, v,
        dimension_numbers=(((2,), (1,)), ((0,), (0,))),
        preferred_element_type=jnp.float32,
    )

    # Concatenate heads -> (T, E) and zero-pad lanes to the 128-multiple output
    # width so the final store is a full (unmasked) vst.
    pieces = [o[h] for h in range(H)]
    pad = o_ref.shape[2] - E
    if pad > 0:
        pieces.append(jnp.zeros((T, pad), jnp.float32))
    o_ref[0] = jnp.concatenate(pieces, axis=-1).astype(o_ref.dtype)


def multi_head_attention(x, wq, bq, wk, bk, wv, bv, *, num_heads: int):
    """x: (B, T, E); w*: (E, E) pre-transposed (y = x @ W + b); b*: (1, E)."""
    B, T, E = x.shape
    H = num_heads
    D = E // H

    # Wrapper-side layout plumbing: per-head fused QKV weight + bias.
    def per_head_w(w):          # (E, E) -> (H, E, D)
        return w.reshape(E, H, D).transpose(1, 0, 2)

    def per_head_b(b):          # (1, E) -> (H, 1, D)
        return b.reshape(1, H, D).transpose(1, 0, 2)

    w_qkv = jnp.concatenate([per_head_w(wq), per_head_w(wk), per_head_w(wv)], axis=-1)
    b_qkv = jnp.concatenate([per_head_b(bq), per_head_b(bk), per_head_b(bv)], axis=-1)

    # Causal mask, same as the module's registered buffer sliced to (T, T).
    mask = jnp.tril(jnp.ones((T, T), dtype=jnp.float32))

    E_pad = pl.cdiv(E, 128) * 128          # lane-dense output slab width

    kernel = functools.partial(_mha_kernel, num_heads=H, head_dim=D)

    out_padded = pl.pallas_call(
        kernel,
        out_shape=jax.ShapeDtypeStruct((B, T, E_pad), jnp.float32),
        grid_spec=pltpu.PrefetchScalarGridSpec(
            num_scalar_prefetch=0,
            grid=(B,),                                           # parallel over batch
            in_specs=[
                pl.BlockSpec((1, T, E), lambda b: (b, 0, 0)),            # x
                pl.BlockSpec((H, E, 3 * D), lambda b: (0, 0, 0)),        # fused QKV weight
                pl.BlockSpec((H, 1, 3 * D), lambda b: (0, 0, 0)),        # fused QKV bias
                pl.BlockSpec((T, T), lambda b: (0, 0)),                  # causal mask
            ],
            out_specs=pl.BlockSpec((1, T, E_pad), lambda b: (b, 0, 0)),
        ),
        compiler_params=pltpu.CompilerParams(
            dimension_semantics=("parallel",)),
    )(x, w_qkv, b_qkv, mask)

    # TODO(synk): for long sequences, tile over KV with an online-softmax (flash)
    # loop instead of materializing the full (T, T) score matrix per head.
    return out_padded[:, :, :E] if E_pad != E else out_padded


def _reference(x, wq, bq, wk, bk, wv, bv, num_heads):
    """Pure-JAX mirror of the PyTorch forward (eval mode)."""
    B, T, E = x.shape
    D = E // num_heads
    q = (x @ wq + bq).reshape(B, T, num_heads, D).transpose(0, 2, 1, 3)
    k = (x @ wk + bk).reshape(B, T, num_heads, D).transpose(0, 2, 1, 3)
    v = (x @ wv + bv).reshape(B, T, num_heads, D).transpose(0, 2, 1, 3)
    attn = jnp.einsum("bhqd,bhkd->bhqk", q, k) * (1.0 / math.sqrt(D))
    mask = jnp.tril(jnp.ones((T, T)))[None, None]
    attn = jnp.where(mask == 0, -jnp.inf, attn)
    w = jax.nn.softmax(attn, axis=-1)
    out = jnp.einsum("bhqk,bhkd->bhqd", w, v)
    return out.transpose(0, 2, 1, 3).reshape(B, T, E)


if __name__ == "__main__":
    # Config (small, consistent with the module): embed_dim=32, num_heads=4,
    # seq_len=8, batch=2, max_len >= seq_len.
    B, T, E, H = 2, 8, 32, 4

    key = jax.random.PRNGKey(0)
    kx, kq, kk, kv, kbq, kbk, kbv = jax.random.split(key, 7)

    bound = 1.0 / math.sqrt(E)
    x = jax.random.normal(kx, (B, T, E), dtype=jnp.float32)
    # Weights stored pre-transposed: y = x @ W + b  (equivalent to nn.Linear).
    wq = jax.random.uniform(kq, (E, E), jnp.float32, -bound, bound)
    wk = jax.random.uniform(kk, (E, E), jnp.float32, -bound, bound)
    wv = jax.random.uniform(kv, (E, E), jnp.float32, -bound, bound)
    bq = jax.random.uniform(kbq, (1, E), jnp.float32, -bound, bound)
    bk = jax.random.uniform(kbk, (1, E), jnp.float32, -bound, bound)
    bv = jax.random.uniform(kbv, (1, E), jnp.float32, -bound, bound)

    out = multi_head_attention(x, wq, bq, wk, bk, wv, bv, num_heads=H)
    out = jax.block_until_ready(out)

    ref = _reference(x, wq, bq[0], wk, bk[0], wv, bv[0], H)
    # Tolerance accounts for the EUP approximate reciprocal in the softmax
    # normalizer (pl.reciprocal(approx=True)).
    np.testing.assert_allclose(np.asarray(out), np.asarray(ref), rtol=1e-2, atol=1e-2)

    print("KERNEL_OK")
</pallas_src>

<mosaic_0001>
module attributes {stable_mosaic.version = 11 : i64} {
  func.func @_mha_kernel(%arg0: i32, %arg1: memref<1x8x32xf32, #tpu.memory_space<vmem>>, %arg2: memref<4x32x24xf32, #tpu.memory_space<vmem>>, %arg3: memref<4x1x24xf32, #tpu.memory_space<vmem>>, %arg4: memref<8x8xf32, #tpu.memory_space<vmem>>, %arg5: memref<1x8x128xf32, #tpu.memory_space<vmem>>) attributes {dimension_semantics = [#tpu.dimension_semantics<parallel>], iteration_bounds = array<i64: 2>, scalar_prefetch = 0 : i64, scratch_operands = 0 : i64, tpu.core_type = #tpu.core_type<tc>, window_params = [{transform_indices = @transform_0, window_bounds = array<i64: 1, 8, 32>}, {pipeline_mode = #tpu.pipeline_mode<synchronous>, transform_indices = @transform_1, window_bounds = array<i64: 4, 32, 24>}, {pipeline_mode = #tpu.pipeline_mode<synchronous>, transform_indices = @transform_2, window_bounds = array<i64: 4, 1, 24>}, {pipeline_mode = #tpu.pipeline_mode<synchronous>, transform_indices = @transform_3, window_bounds = array<i64: 8, 8>}, {transform_indices = @transform_4, window_bounds = array<i64: 1, 8, 128>}]} {
    %c0 = arith.constant 0 : index
    %c0_0 = arith.constant 0 : index
    %c0_1 = arith.constant 0 : index
    %0 = vector.load %arg1[%c0, %c0_0, %c0_1] : memref<1x8x32xf32, #tpu.memory_space<vmem>>, vector<1x8x32xf32>
    %1 = vector.shape_cast %0 : vector<1x8x32xf32> to vector<8x32xf32>
    %2 = vector.shape_cast %1 : vector<8x32xf32> to vector<1x8x32xf32>
    %3 = vector.broadcast %2 : vector<1x8x32xf32> to vector<4x8x32xf32>
    %c0_2 = arith.constant 0 : index
    %c0_3 = arith.constant 0 : index
    %c0_4 = arith.constant 0 : index
    %4 = vector.load %arg2[%c0_2, %c0_3, %c0_4] : memref<4x32x24xf32, #tpu.memory_space<vmem>>, vector<4x32x24xf32>
    %cst = arith.constant dense<0.000000e+00> : vector<4x8x24xf32>
    %5 = tpu.matmul %3, %4, %cst {dimension_numbers = #tpu.dot_dimension_numbers<[2], [1], [1], [2], [0, 0, 0, 1, 1, 2], [0], [0]>} : vector<4x8x32xf32>, vector<4x32x24xf32>, vector<4x8x24xf32> -> vector<4x8x24xf32>
    %c0_5 = arith.constant 0 : index
    %c0_6 = arith.constant 0 : index
    %c0_7 = arith.constant 0 : index
    %6 = vector.load %arg3[%c0_5, %c0_6, %c0_7] : memref<4x1x24xf32, #tpu.memory_space<vmem>>, vector<4x1x24xf32>
    %7 = vector.broadcast %6 : vector<4x1x24xf32> to vector<4x8x24xf32>
    %8 = arith.addf %5, %7 : vector<4x8x24xf32>
    %9 = vector.extract_strided_slice %8 {offsets = [0, 0, 0], sizes = [4, 8, 8], strides = [1, 1, 1]} : vector<4x8x24xf32> to vector<4x8x8xf32>
    %10 = vector.extract_strided_slice %8 {offsets = [0, 0, 8], sizes = [4, 8, 8], strides = [1, 1, 1]} : vector<4x8x24xf32> to vector<4x8x8xf32>
    %11 = vector.extract_strided_slice %8 {offsets = [0, 0, 16], sizes = [4, 8, 8], strides = [1, 1, 1]} : vector<4x8x24xf32> to vector<4x8x8xf32>
    %cst_8 = arith.constant dense<0.000000e+00> : vector<4x8x8xf32>
    %12 = tpu.matmul %9, %10, %cst_8 {dimension_numbers = #tpu.dot_dimension_numbers<[2], [2], [1], [1], [0, 0, 0, 1, 1, 1], [0], [0]>} : vector<4x8x8xf32>, vector<4x8x8xf32>, vector<4x8x8xf32> -> vector<4x8x8xf32>
    %cst_9 = arith.constant 0.353553385 : f32
    %13 = vector.broadcast %cst_9 : f32 to vector<4x8x8xf32>
    %14 = arith.mulf %12, %13 : vector<4x8x8xf32>
    %c0_10 = arith.constant 0 : index
    %c0_11 = arith.constant 0 : index
    %15 = vector.load %arg4[%c0_10, %c0_11] : memref<8x8xf32, #tpu.memory_space<vmem>>, vector<8x8xf32>
    %cst_12 = arith.constant 0.000000e+00 : f32
    %16 = vector.broadcast %cst_12 : f32 to vector<8x8xf32>
    %17 = arith.cmpf oeq, %15, %16 : vector<8x8xf32>
    %cst_13 = arith.constant 0xFF800000 : f32
    %18 = vector.shape_cast %17 : vector<8x8xi1> to vector<1x8x8xi1>
    %19 = vector.broadcast %18 : vector<1x8x8xi1> to vector<4x8x8xi1>
    %20 = vector.broadcast %cst_13 : f32 to vector<4x8x8xf32>
    %21 = arith.select %19, %20, %14 : vector<4x8x8xi1>, vector<4x8x8xf32>
    %cst_14 = arith.constant dense<0xFF800000> : vector<4x8xf32>
    %22 = vector.multi_reduction <maximumf>, %21, %cst_14 [2] : vector<4x8x8xf32> to vector<4x8xf32>
    %23 = vector.shape_cast %22 : vector<4x8xf32> to vector<4x8x1xf32>
    %24 = vector.broadcast %23 : vector<4x8x1xf32> to vector<4x8x8xf32>
    %25 = arith.subf %21, %24 : vector<4x8x8xf32>
    %26 = math.exp %25 : vector<4x8x8xf32>
    %cst_15 = arith.constant dense<0.000000e+00> : vector<4x8xf32>
    %27 = vector.multi_reduction <add>, %26, %cst_15 [2] : vector<4x8x8xf32> to vector<4x8xf32>
    %28 = vector.shape_cast %27 : vector<4x8xf32> to vector<4x8x1xf32>
    %29 = tpu.reciprocal %28 {approx = true} : vector<4x8x1xf32> -> vector<4x8x1xf32>
    %30 = vector.broadcast %29 : vector<4x8x1xf32> to vector<4x8x8xf32>
    %31 = arith.mulf %26, %30 : vector<4x8x8xf32>
    %cst_16 = arith.constant dense<0.000000e+00> : vector<4x8x8xf32>
    %32 = tpu.matmul %31, %11, %cst_16 {dimension_numbers = #tpu.dot_dimension_numbers<[2], [1], [1], [2], [0, 0, 0, 1, 1, 2], [0], [0]>} : vector<4x8x8xf32>, vector<4x8x8xf32>, vector<4x8x8xf32> -> vector<4x8x8xf32>
    %33 = vector.extract_strided_slice %32 {offsets = [0, 0, 0], sizes = [1, 8, 8], strides = [1, 1, 1]} : vector<4x8x8xf32> to vector<1x8x8xf32>
    %34 = vector.shape_cast %33 : vector<1x8x8xf32> to vector<8x8xf32>
    %35 = vector.extract_strided_slice %32 {offsets = [1, 0, 0], sizes = [1, 8, 8], strides = [1, 1, 1]} : vector<4x8x8xf32> to vector<1x8x8xf32>
    %36 = vector.shape_cast %35 : vector<1x8x8xf32> to vector<8x8xf32>
    %37 = vector.extract_strided_slice %32 {offsets = [2, 0, 0], sizes = [1, 8, 8], strides = [1, 1, 1]} : vector<4x8x8xf32> to vector<1x8x8xf32>
    %38 = vector.shape_cast %37 : vector<1x8x8xf32> to vector<8x8xf32>
    %39 = vector.extract_strided_slice %32 {offsets = [3, 0, 0], sizes = [1, 8, 8], strides = [1, 1, 1]} : vector<4x8x8xf32> to vector<1x8x8xf32>
    %40 = vector.shape_cast %39 : vector<1x8x8xf32> to vector<8x8xf32>
    %cst_17 = arith.constant 0.000000e+00 : f32
    %41 = vector.broadcast %cst_17 : f32 to vector<8x96xf32>
    %42 = tpu.concatenate %34, %36, %38, %40, %41 in 1 : vector<8x8xf32>, vector<8x8xf32>, vector<8x8xf32>, vector<8x8xf32>, vector<8x96xf32> -> vector<8x128xf32>
    %c0_18 = arith.constant 0 : index
    %c0_19 = arith.constant 0 : index
    %c0_20 = arith.constant 0 : index
    %43 = vector.load %arg5[%c0_18, %c0_19, %c0_20] : memref<1x8x128xf32, #tpu.memory_space<vmem>>, vector<1x8x128xf32>
    %44 = vector.shape_cast %43 : vector<1x8x128xf32> to vector<8x128xf32>
    %45 = vector.shape_cast %42 : vector<8x128xf32> to vector<1x8x128xf32>
    tpu.vector_store %arg5[%c0_18, %c0_19, %c0_20], %45 {strides = array<i32>} : memref<1x8x128xf32, #tpu.memory_space<vmem>>, vector<1x8x128xf32>,
    return
  }
  func.func @transform_0(%arg0: i32) -> (i32, i32, i32) {
    %c0_i32 = arith.constant 0 : i32
    %c0_i32_0 = arith.constant 0 : i32
    %c0_i32_1 = arith.constant 0 : i32
    return %arg0, %c0_i32, %c0_i32_0 : i32, i32, i32
  }
  func.func @transform_1(%arg0: i32) -> (i32, i32, i32) {
    %c0_i32 = arith.constant 0 : i32
    %c0_i32_0 = arith.constant 0 : i32
    %c0_i32_1 = arith.constant 0 : i32
    %c0_i32_2 = arith.constant 0 : i32
    return %c0_i32, %c0_i32_0, %c0_i32_1 : i32, i32, i32
  }
  func.func @transform_2(%arg0: i32) -> (i32, i32, i32) {
    %c0_i32 = arith.constant 0 : i32
    %c0_i32_0 = arith.constant 0 : i32
    %c0_i32_1 = arith.constant 0 : i32
    %c0_i32_2 = arith.constant 0 : i32
    return %c0_i32, %c0_i32_0, %c0_i32_1 : i32, i32, i32
  }
  func.func @transform_3(%arg0: i32) -> (i32, i32) {
    %c0_i32 = arith.constant 0 : i32
    %c0_i32_0 = arith.constant 0 : i32
    %c0_i32_1 = arith.constant 0 : i32
    return %c0_i32, %c0_i32_0 : i32, i32
  }
  func.func @transform_4(%arg0: i32) -> (i32, i32, i32) {
    %c0_i32 = arith.constant 0 : i32
    %c0_i32_0 = arith.constant 0 : i32
    %c0_i32_1 = arith.constant 0 : i32
    return %arg0, %c0_i32, %c0_i32_0 : i32, i32, i32
  }
}

</mosaic_0001>

<bundles_post_ra>
// kernel: tpu_custom_call.1
= control target key start
LH: loop header
LB: loop body
LE: loop exit
PB: predicated region body
PF: predicated region fallthrough
CT: control target
= control target key end

     0   :  { %9 = vsyncpa [#allocation3], 0  ;;  %s1848_s0 = inlined_call_operand.vmem [shape: f32[2,8,32], index: 0, kind: input, shape index: {}]   ;;  %s1849_s1 = inlined_call_operand.vmem [shape: f32[4,32,24], index: 1, kind: input, shape index: {}]   ;;  %s1850_s2 = inlined_call_operand.vmem [shape: f32[4,1,24], index: 2, kind: input, shape index: {}]   ;;  %s1851_s3 = inlined_call_operand.vmem [shape: f32[8,8], index: 3, kind: input, shape index: {}]   ;;  %s1852_s4 = inlined_call_operand.hbm [shape: f32[2,8,128], index: 4, kind: output, shape index: {}]  }
   0x1   :  { %11 = vsyncpa [#allocation3 + $0x1], 0  ;;  %s1590_s15 = smov 0   ;;  %s1592_s16 = smov 0  }
   0x2   :  { %s1594_s17 = smov 0   ;;  %s1596_s18 = smov 0  }
   0x3 LB: > { %s1611_s19 = sadd.s32 4294967295, %s1555_s18   ;;  %s1283_s20 = sadd.s32 4294967294, %s1555_s18   ;;  %s1555_s18 = sphi %s1596_s18, %s1858_s18   ;;  %s1551_s17 = sphi %s1594_s17, %s1857_s17   ;;  %s1547_s16 = sphi %s1592_s16, %s1856_s16   ;;  %s1543_s15 = sphi %s1590_s15, %s1855_s15  }
   0x4   : > { %s1615_s21 = sadd.s32 1, %s1555_s18   ;;  %s113_s22 = sadd.s32 1, %s1551_s17 }
   0x5   : > { %s110_s23 = ssub.s32 %s1555_s18, %s1615_s21  ;;  %p123_p0 = scmp.ne.s32.totalorder %s1551_s17, %s1547_s16 }
   0x6   : > { %p111_p1 = scmp.eq.s32.totalorder %s110_s23, 0  ;;  %p124_p2 = scmp.eq.s32.totalorder %s1611_s19, 1 }
   0x7   : > { %p129_p3 = scmp.ne.s32.totalorder %s1547_s16, %s1543_s15  ;;  %p130_p4 = scmp.eq.s32.totalorder %s1283_s20, 1 }
   0x8   : > { %s1626_s24 = scalar_select %p111_p1, %s1551_s17, %s113_s22  }
   0x9   : > { %p1628_p5 = por %p124_p2, %p123_p0  ;;  %p1632_p6 = por %p130_p4, %p129_p3 }
   0xa   : > { %p1286_p7 = scmp.ge.s32.totalorder %s1555_s18, 1  ;;  %p164_p8 = scmp.lt.s32.totalorder %s1555_s18, 3 }
   0xc   : > { %p165_p9 = pnand %p1286_p7, %p164_p8 }
   0xd   : > { %p189_p10 = scmp.lt.s32.totalorder (!%p165_p9), %s1611_s19, 1  ;;  %s1559_s8 = smov (!%p165_p9), 120  }
   0xe   : > { %168 = sbr.rel (%p165_p9) target bundleno = 1185 (0x4a1), region = 36  ;;  %s1560_s20 = smov (!%p165_p9), 112  }
   0xf   : > { %s1561_s22 = smov (!%p165_p9), 8   ;;  %s1562_s23 = smov (!%p165_p9), 16  }
  0x10   : > { %s1563_s27 = smov (!%p165_p9), 24   ;;  %s1310_s30 = sshll.u32 (!%p165_p9), %s1611_s19, 7 }
  0x13   : > { %v197_v0 = vld [vmem:[%s1849_s1 + $0x18] sm:$0xff]  ;;  %v1557_v2 = vmov 0.0   ;;  %v196_v3 = vld [vmem:[%s1849_s1 + $0x10] sm:$0xff]  ;;  %s190_s9 = scalar_select %p189_p10, %s1611_s19, 1  ;;  %v195_v5 = vld [vmem:[%s1849_s1 + $0x8] sm:$0xff]  ;;  %vm1558_vm0 = vmmov 0  }
  0x14   : > { %v201_v1 = vld [vmem:[%s1849_s1 + $0x38] sm:$0xff]  ;;  %1349 = vmatprep.subr.mxu0 %v1557_v2  ;;  %1360 = vmatprep.subr.mxu1 %v1557_v2  ;;  %v200_v4 = vld [vmem:[%s1849_s1 + $0x30] sm:$0xff]  ;;  %v199_v6 = vld [vmem:[%s1849_s1 + $0x28] sm:$0xff]  ;;  %vm238_vm1 = vcmask 261120   ;;  %vm525_vm2 = vcmask 64512   ;;  %vm1204_vm4 = vcmask 130048  }
  0x15   : > { %1350 = vmatpush3.msra.mxu0 %v197_v0  ;;  %1361 = vmatpush3.msra.mxu1 %v201_v1  ;;  %s1288_s14 = sshll.u32 %s190_s9, 3  ;;  %v194_v7 = vld [vmem:[%s1849_s1] sm:$0xff]  ;;  %v205_v10 = vld [vmem:[%s1849_s1 + $0x58] sm:$0xff]  ;;  %v204_v11 = vld [vmem:[%s1849_s1 + $0x50] sm:$0xff]  ;;  %vm1206_vm5 = vcmask 195584   ;;  %s1812_s9 = scalar_lea.hbm %s1852_s4, %s1310_s30 }
  0x16   : > { %1351 = vmatprep.subr.mxu0 %v1557_v2  ;;  %1362 = vmatprep.subr.mxu1 %v1557_v2  ;;  %s192_s28 = scalar_lea.vmem %s1848_s0, %s1288_s14  ;;  %v198_v9 = vld [vmem:[%s1849_s1 + $0x20] sm:$0xff]  ;;  %v209_v12 = vld [vmem:[%s1849_s1 + $0x78] sm:$0xff]  ;;  %v203_v13 = vld [vmem:[%s1849_s1 + $0x48] sm:$0xff]  ;;  %s1564_s19 = smov [#allocation2]  }
  0x17   : > { %1352 = vmatpush3.msra.mxu0 %v196_v3  ;;  %1363 = vmatpush3.msra.mxu1 %v200_v4  ;;  %v193_v8 = vld [vmem:[%s192_s28] sm:$0xff]  ;;  %v208_v14 = vld [vmem:[%s1849_s1 + $0x70] sm:$0xff]  ;;  %v207_v16 = vld [vmem:[%s1849_s1 + $0x68] sm:$0xff]  ;;  %s186_s28 = sand.u32 1, %s1547_s16   ;;  %s1499_s12 = sshll.u32 %s1564_s19, 4  ;;  %s1500_s12 = int_to_ptr.vmem [resolvable:$false] %s1499_s12 }
  0x18   : > { %1353 = vmatprep.subr.mxu0 %v1557_v2  ;;  %1364 = vmatprep.subr.mxu1 %v1557_v2  ;;  %v202_v15 = vld [vmem:[%s1849_s1 + $0x40] sm:$0xff]  ;;  %s1287_s29 = sshll.u32 %s186_s28, 3  ;;  %s1211_s10 = scalar_lea.sflag [#allocation3], %s186_s28 }
  0x19   : > { %1354 = vmatpush3.msra.mxu0 %v195_v5  ;;  %1357 = vmatprep.mubr.msk.f32.mxu0 %vm1558_vm0, %v1557_v2  ;;  %v206_v17 = vld [vmem:[%s1849_s1 + $0x60] sm:$0xff]  ;;  %s188_s5 = scalar_lea.vmem [#allocation2], %s1287_s29  ;;  %s1501_s13 = scalar_lea.vmem %s1500_s12, 256 }
  0x1a   : > { %1355 = vmatprep.subr.mxu0 %v1557_v2  ;;  %1365 = vmatpush3.msra.mxu1 %v199_v6  ;;  %v1289_v18 = vld [vmem:[%s1850_s2] ss:$0 sm:$0xff]  ;;  %v1290_v21 = vld [vmem:[%s1850_s2 + $0x1] ss:$0 sm:$0xff]  ;;  %v1291_v26 = vld [vmem:[%s1850_s2 + $0x2] ss:$0 sm:$0xff] }
  0x1b   : > { %1356 = vmatpush3.msra.mxu0 %v194_v7  ;;  %1366 = vmatprep.subr.mxu1 %v1557_v2  ;;  %v1292_v29 = vld [vmem:[%s1850_s2 + $0x3] ss:$0 sm:$0xff]  ;;  %s1224_s6 = sshll.u32 %s188_s5, 4  ;;  %s1225_s6 = int_to_ptr.vmem [resolvable:$true] %s1224_s6 }
  0x1c   : > { %1358 = vmatmul.mubr.msk.f32.vlgmr.msra.gmra.mxu0 %vm238_vm1, %v193_v8  ;;  %1371 = vmatprep.subr.mxu0 %v1557_v2  ;;  %v835_v38 = vld [vmem:[%s1851_s3] sm:$0xff]  ;;  %s1495_s11 = scalar_lea.vmem %s1225_s6, 128  ;;  %p1502_p0 = scmp.lt.s32.totalorder %s1225_s6, %s1500_s12 }
  0x1d   : > { %1367 = vmatpush3.msra.mxu1 %v198_v9  ;;  %1372 = vmatpush3.msra.mxu0 %v205_v10  ;;  %vm836_vm3 = vcmp.eq.f32.partialorder %v835_v38, 0.0  ;;  %p1496_p11 = scmp.ne.s32.totalorder %s1225_s6, %s1495_s11  ;;  %p1503_p1 = scmp.lt.s32.totalorder %s1501_s13, %s1495_s11 }
  0x1e   : > { %1368 = vmatprep.mubr.msk.f32.mxu1 %vm1558_vm0, %v1557_v2  ;;  %1373 = vmatprep.subr.mxu0 %v1557_v2 }
  0x1f   : > { %1382 = vmatprep.subr.mxu1 %v1557_v2  ;;  %1369 = vmatmul.mubr.msk.f32.vlgmr.msra.gmra.mxu1 %vm238_vm1, %v193_v8  ;;  %p1497_p12 = pnand %p1496_p11, %p1628_p5  ;;  %p1504_p2 = por %p1503_p1, %p1502_p0 }
  0x20   : > { %1374 = vmatpush3.msra.mxu0 %v204_v11  ;;  %1383 = vmatpush3.msra.mxu1 %v209_v12 }
  0x21   : > { %1375 = vmatprep.subr.mxu0 %v1557_v2  ;;  %1384 = vmatprep.subr.mxu1 %v1557_v2  ;;  %p1498_p13 = pneg %p1497_p12 }
  0x22   : > { %1376 = vmatpush3.msra.mxu0 %v203_v13  ;;  %1385 = vmatpush3.msra.mxu1 %v208_v14 }
  0x23   : > { %1377 = vmatprep.subr.mxu0 %v1557_v2  ;;  %1386 = vmatprep.subr.mxu1 %v1557_v2  ;;  %p1505_p3 = pnand %p1504_p2, %p1498_p13 }
  0x24   : > { %1378 = vmatpush3.msra.mxu0 %v202_v15  ;;  %1379 = vmatprep.mubr.msk.f32.mxu0 %vm1558_vm0, %v1557_v2 }
  0x25   : > { %1387 = vmatpush3.msra.mxu1 %v207_v16  ;;  %1380 = vmatmul.mubr.msk.f32.vlgmr.msra.gmra.mxu0 %vm238_vm1, %v193_v8 }
  0x26   : > { %1388 = vmatprep.subr.mxu1 %v1557_v2  ;;  %1390 = vmatprep.mubr.msk.f32.mxu1 %vm1558_vm0, %v1557_v2 }
  0x27   : > { %1389 = vmatpush3.msra.mxu1 %v206_v17  ;;  %1393 = vmatprep.subr.mxu0 %v1557_v2 }
  0x28   : > { %1391 = vmatmul.mubr.msk.f32.vlgmr.msra.gmra.mxu1 %vm238_vm1, %v193_v8  ;;  %1395 = vmatprep.mubr.msk.f32.mxu0 %vm1558_vm0, %v1557_v2 }
  0x29   : > { %1398 = vmatprep.subr.mxu1 %v1557_v2  ;;  %1400 = vmatprep.mubr.msk.f32.mxu1 %vm1558_vm0, %v1557_v2 }
  0xdc   : > { %v308_v19 = vpop.f32.mrf.mxu0 }
  0xdd   : > { %v1728_v20 = vadd.f32 %v1289_v18, %v308_v19 }
  0xde   : > { %v1359_v22 = vpop.f32.mrf.mxu0 }
  0xdf   : > { %v378_v23 = vpop.f32.mrf.mxu1  ;;  %523 = vrot.lane.b32.xlu0 %v1728_v20, %s1559_s8 }
  0xe0   : > { %v1734_v24 = vadd.f32 %v1290_v21, %v378_v23 }
  0xe1   : > { %v1370_v25 = vpop.f32.mrf.mxu1 }
  0xe3   : > { %601 = vrot.lane.b32.xlu0 %v1734_v24, %s1559_s8 }
  0xe5   : > { %v448_v27 = vpop.f32.mrf.mxu0 }
  0xe6   : > { %v1740_v28 = vadd.f32 %v1291_v26, %v448_v27 }
  0xe7   : > { %v1381_v30 = vpop.f32.mrf.mxu0 }
  0xe8   : > { %v518_v31 = vpop.f32.mrf.mxu1  ;;  %678 = vrot.lane.b32.xlu1 %v1740_v28, %s1559_s8 }
  0xe9   : > { %v1746_v32 = vadd.f32 %v1292_v29, %v518_v31 }
  0xea   : > { %v1392_v33 = vpop.f32.mrf.mxu1 }
  0xec   : > { %755 = vrot.lane.b32.xlu1 %v1746_v32, %s1559_s8 }
 0x151   : > { %v524_v34 = vpop.permute.xlu0 %523 }
 0x152   : > { %1394 = vmatpush3.xpose.msk.msra.mxu0 %vm525_vm2, %v524_v34 }
 0x153   : > { %1403 = vmatprep.subr.mxu0 %v1557_v2 }
 0x155   : > { %1396 = vmatmul.mubr.msk.f32.vlgmr.msra.gmra.mxu0 %vm525_vm2, %v1728_v20  ;;  %v602_v35 = vpop.permute.xlu0 %601 }
 0x156   : > { %1399 = vmatpush3.xpose.msk.msra.mxu1 %vm525_vm2, %v602_v35  ;;  %1405 = vmatprep.mubr.msk.f32.mxu0 %vm1558_vm0, %v1557_v2 }
 0x157   : > { %1408 = vmatprep.subr.mxu1 %v1557_v2 }
 0x159   : > { %1401 = vmatmul.mubr.msk.f32.vlgmr.msra.gmra.mxu1 %vm525_vm2, %v1734_v24 }
 0x15a   : > { %v679_v36 = vpop.permute.xlu1 %678  ;;  %1410 = vmatprep.mubr.msk.f32.mxu1 %vm1558_vm0, %v1557_v2 }
 0x15b   : > { %1404 = vmatpush3.xpose.msk.msra.mxu0 %vm525_vm2, %v679_v36 }
 0x15c   : > { %1413 = vmatprep.subr.mxu0 %v1557_v2 }
 0x15e   : > { %1406 = vmatmul.mubr.msk.f32.vlgmr.msra.gmra.mxu0 %vm525_vm2, %v1740_v28  ;;  %v756_v37 = vpop.permute.xlu1 %755 }
 0x15f   : > { %1409 = vmatpush3.xpose.msk.msra.mxu1 %vm525_vm2, %v756_v37  ;;  %1415 = vmatprep.mubr.msk.f32.mxu0 %vm1558_vm0, %v1557_v2 }
 0x160   : > { %1418 = vmatprep.subr.mxu1 %v1557_v2 }
 0x162   : > { %1411 = vmatmul.mubr.msk.f32.vlgmr.msra.gmra.mxu1 %vm525_vm2, %v1746_v32 }
 0x163   : > { %1420 = vmatprep.mubr.msk.f32.mxu1 %vm1558_vm0, %v1557_v2 }
 0x215   : > { %v596_v39 = vpop.f32.mrf.mxu0 }
 0x216   : > { %v831_v40 = vmul.f32 0.35355338, %v596_v39 }
 0x217   : > { %v1397_v41 = vpop.f32.mrf.mxu0 }
 0x218   : > { %v839_v42 = vsel %vm836_vm3, -inf, %v831_v40 }
 0x219   : > { %v673_v43 = vpop.f32.mrf.mxu1  ;;  %v843_v44 = vsel %vm525_vm2, %v839_v42, -inf }
 0x21a   : > { %v832_v45 = vmul.f32 0.35355338, %v673_v43  ;;  %844 = vmax.xlane.f32.xlu0 %v843_v44 }
 0x21b   : > { %v1402_v46 = vpop.f32.mrf.mxu1 }
 0x21c   : > { %v840_v47 = vsel %vm836_vm3, -inf, %v832_v45 }
 0x21d   : > { %v846_v48 = vsel %vm525_vm2, %v840_v47, -inf }
 0x21e   : > { %v750_v49 = vpop.f32.mrf.mxu0  ;;  %847 = vmax.xlane.f32.xlu1 %v846_v48 }
 0x21f   : > { %v833_v50 = vmul.f32 0.35355338, %v750_v49 }
 0x220   : > { %v1407_v51 = vpop.f32.mrf.mxu0 }
 0x221   : > { %v841_v52 = vsel %vm836_vm3, -inf, %v833_v50 }
 0x222   : > { %v827_v53 = vpop.f32.mrf.mxu1  ;;  %v849_v54 = vsel %vm525_vm2, %v841_v52, -inf }
 0x223   : > { %v834_v55 = vmul.f32 0.35355338, %v827_v53  ;;  %850 = vmax.xlane.f32.xlu0 %v849_v54 }
 0x224   : > { %v1412_v56 = vpop.f32.mrf.mxu1 }
 0x225   : > { %v842_v57 = vsel %vm836_vm3, -inf, %v834_v55 }
 0x226   : > { %v852_v58 = vsel %vm525_vm2, %v842_v57, -inf }
 0x227   : > { %853 = vmax.xlane.f32.xlu0 %v852_v58 }
 0x22f   : > { %887 = vrot.lane.b32.xlu1 %v1728_v20, %s1560_s20 }
 0x2a3   : > { %v845_v59 = vpop.xlane.xlu0 %844 }
 0x2a4   : > { %v855_v60 = vsub.f32 %v839_v42, %v845_v59 }
 0x2a6   : > { %v859_v61 = vmul.f32 1.442695, %v855_v60 }
 0x2a7   : > { %v848_v62 = vpop.xlane.xlu1 %847 }
 0x2a8   : > { %1479 = vpow2.f32 %v859_v61  ;;  %v856_v63 = vsub.f32 %v840_v47, %v848_v62 }
 0x2aa   : > { %v861_v0 = vmul.f32 1.442695, %v856_v63 }
 0x2ab   : > { %v888_v1 = vpop.permute.xlu1 %887 }
 0x2ac   : > { %1481 = vpow2.f32 %v861_v0  ;;  %v851_v3 = vpop.xlane.xlu0 %850  ;;  %1414 = vmatpush3.msra.mxu0 %v888_v1 }
 0x2ad   : > { %v857_v4 = vsub.f32 %v841_v52, %v851_v3  ;;  %1423 = vmatprep.subr.mxu0 %v1557_v2 }
 0x2af   : > { %v863_v5 = vmul.f32 1.442695, %v857_v4 }
 0x2b0   : > { %v854_v6 = vpop.xlane.xlu0 %853 }
 0x2b1   : > { %1483 = vpow2.f32 %v863_v5  ;;  %v858_v7 = vsub.f32 %v842_v57, %v854_v6 }
 0x2b3   : > { %v865_v8 = vmul.f32 1.442695, %v858_v7 }
 0x2b5   : > { %v1480_v9 = vpop.eup %1479  ;;  %1485 = vpow2.f32 %v865_v8 }
 0x2b6   : > { %v867_v10 = vsel %vm525_vm2, %v1480_v9, 0.0 }
 0x2b7   : > { %868 = vadd.xlane.f32.xlu1 %v867_v10 }
 0x2b9   : > { %v1482_v11 = vpop.eup %1481 }
 0x2ba   : > { %v870_v12 = vsel %vm525_vm2, %v1482_v11, 0.0 }
 0x2bb   : > { %871 = vadd.xlane.f32.xlu0 %v870_v12 }
 0x2be   : > { %v1484_v13 = vpop.eup %1483 }
 0x2bf   : > { %v873_v14 = vsel %vm525_vm2, %v1484_v13, 0.0 }
 0x2c0   : > { %874 = vadd.xlane.f32.xlu1 %v873_v14 }
 0x2c2   : > { %v1486_v15 = vpop.eup %1485 }
 0x2c3   : > { %v876_v16 = vsel %vm525_vm2, %v1486_v15, 0.0 }
 0x2c4   : > { %877 = vadd.xlane.f32.xlu0 %v876_v16 }
 0x2d1   : > { %1039 = vrot.lane.b32.xlu1 %v1740_v28, %s1560_s20 }
 0x2d5   : > { %1115 = vrot.lane.b32.xlu1 %v1746_v32, %s1560_s20 }
 0x2da   : > { %963 = vrot.lane.b32.xlu0 %v1734_v24, %s1560_s20 }
 0x340   : > { %v869_v17 = vpop.xlane.xlu1 %868 }
 0x341   : > { %1487 = vrcp.f32 %v869_v17 }
 0x344   : > { %v872_v18 = vpop.xlane.xlu0 %871 }
 0x345   : > { %1489 = vrcp.f32 %v872_v18 }
 0x349   : > { %v875_v19 = vpop.xlane.xlu1 %874 }
 0x34a   : > { %1491 = vrcp.f32 %v875_v19 }
 0x34d   : > { %v878_v20 = vpop.xlane.xlu0 %877  ;;  %v1040_v22 = vpop.permute.xlu1 %1039 }
 0x34e   : > { %v1488_v21 = vpop.eup %1487  ;;  %1493 = vrcp.f32 %v878_v20 }
 0x34f   : > { %v883_v23 = vmul.f32 %v1488_v21, %v1480_v9 }
 0x351   : > { %v964_v25 = vpop.permute.xlu0 %963  ;;  %1416 = vmatmul.mubr.msk.f32.vlgmr.msra.gmra.mxu0 %vm525_vm2, %v883_v23  ;;  %v1116_v27 = vpop.permute.xlu1 %1115 }
 0x352   : > { %v1490_v26 = vpop.eup %1489  ;;  %1419 = vmatpush3.msra.mxu1 %v964_v25  ;;  %1424 = vmatpush3.msra.mxu0 %v1040_v22 }
 0x353   : > { %1428 = vmatprep.subr.mxu1 %v1557_v2  ;;  %v884_v24 = vmul.f32 %v1490_v26, %v1482_v11  ;;  %1425 = vmatprep.mubr.msk.f32.mxu0 %vm1558_vm0, %v1557_v2 }
 0x355   : > { %1421 = vmatmul.mubr.msk.f32.vlgmr.msra.gmra.mxu1 %vm525_vm2, %v884_v24 }
 0x356   : > { %1429 = vmatpush3.msra.mxu1 %v1116_v27  ;;  %1430 = vmatprep.mubr.msk.f32.mxu1 %vm1558_vm0, %v1557_v2 }
 0x357   : > { %v1492_v28 = vpop.eup %1491 }
 0x358   : > { %v885_v29 = vmul.f32 %v1492_v28, %v1484_v13 }
 0x35a   : > { %1426 = vmatmul.mubr.msk.f32.vlgmr.msra.gmra.mxu0 %vm525_vm2, %v885_v29 }
 0x35b   : > { %v1494_v30 = vpop.eup %1493 }
 0x35c   : > { %v886_v31 = vmul.f32 %v1494_v30, %v1486_v15 }
 0x35e   : > { %1431 = vmatmul.mubr.msk.f32.vlgmr.msra.gmra.mxu1 %vm525_vm2, %v886_v31 }
 0x411   : > { %v959_v32 = vpop.f32.mrf.mxu0 }
 0x413   : > { %v1417_v33 = vpop.f32.mrf.mxu0 }
 0x415   : > { %v1035_v34 = vpop.f32.mrf.mxu1 }
 0x416   : > { %1192 = vrot.lane.b32.xlu0 %v1035_v34, %s1561_s22 }
 0x417   : > { %v1422_v35 = vpop.f32.mrf.mxu1 }
 0x41a   : > { %v1111_v36 = vpop.f32.mrf.mxu0 }
 0x41b   : > { %1196 = vrot.lane.b32.xlu1 %v1111_v36, %s1562_s23 }
 0x41c   : > { %v1427_v2 = vpop.f32.mrf.mxu0 }
 0x41e   : > { %v1187_v37 = vpop.f32.mrf.mxu1 }
 0x41f   : > { %1200 = vrot.lane.b32.xlu0 %v1187_v37, %s1563_s27 }
 0x420   : > { %v1432_v38 = vpop.f32.mrf.mxu1 }
 0x488   : > { %v1193_v39 = vpop.permute.xlu0 %1192 }
 0x489   : > { %v1203_v41 = vsel %vm525_vm2, %v959_v32, %v1193_v39 }
 0x48d   : > { %v1197_v40 = vpop.permute.xlu1 %1196 }
 0x48e   : > { %v1205_v42 = vsel %vm1204_vm4, %v1203_v41, %v1197_v40 }
 0x491   : > { %v1201_v43 = vpop.permute.xlu0 %1200 }
 0x492   : > { %v1207_v44 = vsel %vm1206_vm5, %v1205_v42, %v1201_v43 }
 0x493   : > { %v1208_v45 = vsel %vm238_vm1, %v1207_v44, 0.0 }
 0x494   : > { %1209 = vst [vmem:[%s188_s5] sm:$0xff] %v1208_v45 }
 0x495   : > { %1508 = shalt.err (!%p1505_p3)
}
 0x496   : > { %s1509_s14 = scalar_lea.hbm %s1812_s9, 128  ;;  %s1513_s23 = scalar_lea.hbm %s1852_s4, 256 }
 0x497   : > { %p1510_p4 = scmp.ne.s32.totalorder %s1812_s9, %s1509_s14  ;;  %p1514_p9 = scmp.lt.s32.totalorder %s1812_s9, %s1852_s4 }
 0x498   : > { %p1515_p10 = scmp.lt.s32.totalorder %s1513_s23, %s1509_s14 }
 0x499   : > { %p1511_p7 = pnand %p1510_p4, %p1628_p5 }
 0x49a   : > { %p1516_p11 = por %p1515_p10, %p1514_p9 }
 0x49b   : > { %p1512_p8 = pneg %p1511_p7 }
 0x49d   : > { %p1517_p12 = pnand %p1516_p11, %p1512_p8 }
 0x49f   : > { %1520 = shalt.err (!%p1517_p12)
}
 0x4a0   : > { %1433 = dma.vmem_to_hbm [thread:$0]  (%p1628_p5), %s1225_s6, 128, %s1812_s9, %s1211_s10  }
 0x4a1 PF: > { %p1439_p13 = scmp.ge.s32.totalorder %s1555_s18, 2  ;;  %s1236_s29 = sand.u32 1, %s1543_s15  }
 0x4a2   : > { %s1237_s30 = scalar_lea.sflag [#allocation3], %s1236_s29 }
 0x4a3   : > { %p1436_p0 = pnand %p1439_p13, %p1632_p6 }
 0x4a5   : > { %p1437_p1 = pneg %p1436_p0 }
 0x4a7   : > { %1538 = dma.done.wait (%p1437_p1), %s1237_s30, 128  }
 0x4a8   : > { %1540 = vsyncadd (%p1437_p1), %s1237_s30, 4294967168  ;;  %p14_p2 = scmp.ge.s32.totalorder %s1615_s21, 4   ;;  %s1855_s15 = smov %s1547_s16 }
 0x4a9   : > { %s1856_s16 = smov %s1551_s17  ;;  %s1857_s17 = smov %s1626_s24 }
 0x4aa   : > { %s1858_s18 = smov %s1615_s21  ;;  %16 = sbr.rel (!%p14_p2) target bundleno = 3 (0x3), region = 71 }
 0x4af   :  { %1242 = vsyncpa [#allocation3], 1 }
 0x4b0   :  { %1244 = vsyncpa [#allocation3 + $0x1], 1 }

</bundles_post_ra>
